<compile_context>
chip_gen: v7x
topology: tpu7x:2x2x1
jax: 0.10.0
libtpu: 0.0.40
codegen_flags: <defaults>
</compile_context>

<pallas_src>
import functools

import jax
import jax.numpy as jnp
from jax.experimental import pallas as pl
from jax.experimental.pallas import tpu as pltpu

BN_EPS = 1e-5


def _round_up(n, m):
    return ((n + m - 1) // m) * m


def _predictor_kernel(s_ref, u_ref, pack_ref, out_ref, *,
                      s_dim, u_dim, hidden, d_out, out_w,
                      off_w1r, off_w2, batch):
    """One grid step == one independent Predictor forward on a full batch."""
    s = s_ref[0]                                   # (B, s_dim)  f32
    u = u_ref[0]                                   # (B, u_dim)  f32
    d_in = s_dim + u_dim

    # Build x = [s | u] in-kernel (lane concat; no XLA-side concat, and the
    # fused weight rows are contiguous in the pack -> a single MXU pass).
    x = jnp.concatenate([s, u], axis=-1)           # (B, d_in)

    # --- unpack parameters (static slices of the VMEM-resident pack) --------
    b1r   = pack_ref[0:1, :hidden + d_out]         # (1, H + d_out)
    gamma = pack_ref[1:2, :hidden]                 # (1, H)
    beta  = pack_ref[2:3, :hidden]                 # (1, H)
    b2    = pack_ref[3:4, :out_w]                  # (1, out_w)  (zero-padded)
    w1r   = pack_ref[off_w1r:off_w1r + d_in, :hidden + d_out]   # (d_in, H+d_out)
    w2    = pack_ref[off_w2:off_w2 + hidden, :out_w]             # (H, out_w)

    # --- single fused fc1 + residual MXU pass --------------------------------
    hr = jnp.dot(x, w1r, preferred_element_type=jnp.float32) + b1r
    h = hr[:, :hidden]                             # fc1 pre-activation
    res = hr[:, hidden:]                           # residual branch (d_out lanes)

    # --- BatchNorm1d (training batch stats, biased var) + ReLU, all f32 -----
    inv_b = 1.0 / batch
    s1 = jnp.sum(h, axis=0, keepdims=True)         # (1, H)
    s2 = jnp.sum(h * h, axis=0, keepdims=True)     # (1, H)
    mean = s1 * inv_b
    var = s2 * inv_b - mean * mean
    scale = gamma * jax.lax.rsqrt(var + BN_EPS)
    shift = beta - mean * scale
    h = jnp.maximum(h * scale + shift, 0.0)        # dropout(p=0) == identity

    # --- fc2 + residual add, written lane-dense (out_w = 128-aligned) -------
    out = jnp.dot(h, w2, preferred_element_type=jnp.float32) + b2
    if out_w > d_out:
        res = jnp.concatenate(
            [res, jnp.zeros((batch, out_w - d_out), jnp.float32)], axis=-1)
    out_ref[0] = out + res


def pack_params(params, s_dim, u_dim):
    """One-time packing of all Predictor parameters into a single f32 buffer.

    Row layout (every section starts at a multiple-of-8 row):
      row 0..3              : b1r=[b1|br] | gamma | beta | b2 (b2 padded to out_w)
      row 4..7              : zero padding
      row 8 .. 8+R(d_in)    : [W1 | Wr]  (d_in rows of width H+d_out)
      row .. + R(H)         : W2 (zero-padded to out_w columns)
    """
    w1, b1 = params["w1"], params["b1"]        # (d_in, H), (H,)
    wr, br = params["wr"], params["br"]        # (d_in, d_out), (d_out,)
    w2, b2 = params["w2"], params["b2"]        # (H, d_out), (d_out,)
    gamma, beta = params["gamma"], params["beta"]

    d_in, hidden = w1.shape
    d_out = w2.shape[1]
    assert d_in == s_dim + u_dim
    out_w = _round_up(d_out, 128)              # lane-dense output width
    width = max(hidden + d_out, out_w)         # pack lane width

    w1r = jnp.concatenate([w1, wr], axis=1).astype(jnp.float32)   # (d_in, H+d_out)
    b1r = jnp.concatenate([b1, br], axis=0).astype(jnp.float32)   # (H + d_out,)

    def vec_row(v):
        v = v.astype(jnp.float32)
        return jnp.pad(v, (0, width - v.shape[0]))[None, :]

    head = jnp.concatenate(
        [vec_row(b1r), vec_row(gamma), vec_row(beta), vec_row(b2),
         jnp.zeros((4, width), jnp.float32)], axis=0)              # (8, width)

    def block(m):
        rows, cols = m.shape
        return jnp.pad(m.astype(jnp.float32),
                       ((0, _round_up(rows, 8) - rows), (0, width - cols)))

    w1r_blk = block(w1r)                       # (round8(d_in), width)
    w2_blk = block(w2)                         # (round8(H),    width)

    pack = jnp.concatenate([head, w1r_blk, w2_blk], axis=0)
    meta = dict(
        s_dim=s_dim, u_dim=u_dim, hidden=hidden, d_out=d_out, out_w=out_w,
        off_w1r=8,
        off_w2=8 + w1r_blk.shape[0],
    )
    return {"pack": pack, "meta": meta}


def predictor_forward(s_prev, u_prev, packed):
    """Hot path.  Accepts (B, dim) for one forward call, or (T, B, dim) for T
    independent Predictor invocations batched into one pallas_call: weights
    stay VMEM-resident across steps, s/u/out blocks pipeline per step."""
    pack, meta = packed["pack"], packed["meta"]
    single = s_prev.ndim == 2
    if single:
        s_prev, u_prev = s_prev[None], u_prev[None]

    T, batch, s_dim = s_prev.shape
    u_dim = u_prev.shape[-1]
    assert (s_dim, u_dim) == (meta["s_dim"], meta["u_dim"])
    hidden, d_out, out_w = meta["hidden"], meta["d_out"], meta["out_w"]
    d_in = s_dim + u_dim

    kernel = functools.partial(_predictor_kernel, batch=batch, **meta)

    flops = T * 2 * batch * (d_in * (hidden + d_out) + hidden * out_w)
    bytes_accessed = 4 * (pack.size + s_prev.size + u_prev.size
                          + T * batch * out_w)
    cost = pl.CostEstimate(flops=flops, transcendentals=T * hidden,
                           bytes_accessed=bytes_accessed)

    out_padded = pl.pallas_call(
        kernel,
        out_shape=jax.ShapeDtypeStruct((T, batch, out_w), jnp.float32),
        grid=(T,),
        in_specs=[
            pl.BlockSpec((1, batch, s_dim), lambda t: (t, 0, 0)),
            pl.BlockSpec((1, batch, u_dim), lambda t: (t, 0, 0)),
            pl.BlockSpec(pack.shape, lambda t: (0, 0)),   # resident weights
        ],
        out_specs=pl.BlockSpec((1, batch, out_w), lambda t: (t, 0, 0)),
        compiler_params=pltpu.CompilerParams(
            dimension_semantics=("arbitrary",)),
        cost_estimate=cost,
    )(s_prev.astype(jnp.float32), u_prev.astype(jnp.float32), pack)

    out = out_padded[..., :d_out]      # drop lane padding (one cheap XLA slice)
    return out[0] if single else out


def init_params(key, input_dim, hidden_dim, output_dim):
    """Deterministic synthetic parameters (PyTorch-like uniform fan-in init)."""
    ks = jax.random.split(key, 6)

    def lin(kw, kb, fan_in, fan_out):
        bound = 1.0 / jnp.sqrt(fan_in)
        w = jax.random.uniform(kw, (fan_in, fan_out), jnp.float32, -bound, bound)
        b = jax.random.uniform(kb, (fan_out,), jnp.float32, -bound, bound)
        return w, b

    w1, b1 = lin(ks[0], ks[1], input_dim, hidden_dim)
    w2, b2 = lin(ks[2], ks[3], hidden_dim, output_dim)
    wr, br = lin(ks[4], ks[5], input_dim, output_dim)
    return {
        "w1": w1, "b1": b1,
        "gamma": jnp.ones((hidden_dim,), jnp.float32),   # BatchNorm1d defaults
        "beta": jnp.zeros((hidden_dim,), jnp.float32),
        "w2": w2, "b2": b2,
        "wr": wr, "br": br,
    }


def _reference(s_prev, u_prev, params):
    x = jnp.concatenate([s_prev, u_prev], axis=-1)
    res = x @ params["wr"] + params["br"]
    h = x @ params["w1"] + params["b1"]
    mean = jnp.mean(h, axis=0, keepdims=True)
    var = jnp.mean((h - mean) ** 2, axis=0, keepdims=True)
    h = (h - mean) / jnp.sqrt(var + BN_EPS) * params["gamma"] + params["beta"]
    h = jnp.maximum(h, 0.0)
    return h @ params["w2"] + params["b2"] + res


if __name__ == "__main__":
    key = jax.random.PRNGKey(0)
    k_s, k_u, k_p = jax.random.split(key, 3)

    T, B = 4, 8                          # T independent forward calls (steps)
    s_dim, u_dim = 16, 16                # input_dim = 32
    hidden_dim, output_dim = 32, 16

    s_steps = jax.random.normal(k_s, (T, B, s_dim), jnp.float32)
    u_steps = jax.random.normal(k_u, (T, B, u_dim), jnp.float32)
    params = init_params(k_p, s_dim + u_dim, hidden_dim, output_dim)
    packed = pack_params(params, s_dim, u_dim)   # one-time, off the hot path

    # TODO(synk): BatchNorm1d running_mean/running_var updates (stateful
    # buffers) are not modeled; only the training-mode forward output is.
    out = predictor_forward(s_steps, u_steps, packed)        # (T, B, d_out)
    jax.block_until_ready(out)

    ref = jnp.stack([_reference(s_steps[t], u_steps[t], params)
                     for t in range(T)])
    assert out.shape == (T, B, output_dim)
    assert jnp.allclose(out, ref, atol=1e-4, rtol=1e-4), \
        float(jnp.max(jnp.abs(out - ref)))

    # Single-step (B, dim) path, matching the PyTorch forward signature.
    out1 = predictor_forward(s_steps[0], u_steps[0], packed)
    jax.block_until_ready(out1)
    assert out1.shape == (B, output_dim)
    assert jnp.allclose(out1, ref[0], atol=1e-4, rtol=1e-4), \
        float(jnp.max(jnp.abs(out1 - ref[0])))

    print("KERNEL_OK")
</pallas_src>

<mosaic_0001>
module attributes {stable_mosaic.version = 11 : i64} {
  func.func @_predictor_kernel(%arg0: i32, %arg1: memref<1x8x16xf32, #tpu.memory_space<vmem>>, %arg2: memref<1x8x16xf32, #tpu.memory_space<vmem>>, %arg3: memref<72x128xf32, #tpu.memory_space<vmem>>, %arg4: memref<1x8x128xf32, #tpu.memory_space<vmem>>) attributes {dimension_semantics = [#tpu.dimension_semantics<arbitrary>], iteration_bounds = array<i64: 4>, scalar_prefetch = 0 : i64, scratch_operands = 0 : i64, tpu.core_type = #tpu.core_type<tc>, window_params = [{transform_indices = @transform_0, window_bounds = array<i64: 1, 8, 16>}, {transform_indices = @transform_1, window_bounds = array<i64: 1, 8, 16>}, {pipeline_mode = #tpu.pipeline_mode<synchronous>, transform_indices = @transform_2, window_bounds = array<i64: 72, 128>}, {transform_indices = @transform_3, window_bounds = array<i64: 1, 8, 128>}]} {
    %c0 = arith.constant 0 : index
    %c0_0 = arith.constant 0 : index
    %c0_1 = arith.constant 0 : index
    %0 = vector.load %arg1[%c0, %c0_0, %c0_1] : memref<1x8x16xf32, #tpu.memory_space<vmem>>, vector<1x8x16xf32>
    %1 = vector.shape_cast %0 : vector<1x8x16xf32> to vector<8x16xf32>
    %c0_2 = arith.constant 0 : index
    %c0_3 = arith.constant 0 : index
    %c0_4 = arith.constant 0 : index
    %2 = vector.load %arg2[%c0_2, %c0_3, %c0_4] : memref<1x8x16xf32, #tpu.memory_space<vmem>>, vector<1x8x16xf32>
    %3 = vector.shape_cast %2 : vector<1x8x16xf32> to vector<8x16xf32>
    %4 = tpu.concatenate %1, %3 in 1 : vector<8x16xf32>, vector<8x16xf32> -> vector<8x32xf32>
    %c0_5 = arith.constant 0 : index
    %c0_6 = arith.constant 0 : index
    %5 = vector.load %arg3[%c0_5, %c0_6] : memref<72x128xf32, #tpu.memory_space<vmem>>, vector<1x48xf32>
    %c1 = arith.constant 1 : index
    %c0_7 = arith.constant 0 : index
    %6 = vector.load %arg3[%c1, %c0_7] : memref<72x128xf32, #tpu.memory_space<vmem>>, vector<1x32xf32>
    %c2 = arith.constant 2 : index
    %c0_8 = arith.constant 0 : index
    %7 = vector.load %arg3[%c2, %c0_8] : memref<72x128xf32, #tpu.memory_space<vmem>>, vector<1x32xf32>
    %c3 = arith.constant 3 : index
    %c0_9 = arith.constant 0 : index
    %8 = vector.load %arg3[%c3, %c0_9] : memref<72x128xf32, #tpu.memory_space<vmem>>, vector<1x128xf32>
    %c8 = arith.constant 8 : index
    %c0_10 = arith.constant 0 : index
    %9 = vector.load %arg3[%c8, %c0_10] : memref<72x128xf32, #tpu.memory_space<vmem>>, vector<32x48xf32>
    %c40 = arith.constant 40 : index
    %c0_11 = arith.constant 0 : index
    %10 = vector.load %arg3[%c40, %c0_11] : memref<72x128xf32, #tpu.memory_space<vmem>>, vector<32x128xf32>
    %cst = arith.constant dense<0.000000e+00> : vector<8x48xf32>
    %11 = tpu.matmul %4, %9, %cst {dimension_numbers = #tpu.dot_dimension_numbers<[1], [0], [0], [1], [0, 0, 1, 1], [], []>} : vector<8x32xf32>, vector<32x48xf32>, vector<8x48xf32> -> vector<8x48xf32>
    %12 = vector.broadcast %5 : vector<1x48xf32> to vector<8x48xf32>
    %13 = arith.addf %11, %12 : vector<8x48xf32>
    %14 = vector.extract_strided_slice %13 {offsets = [0, 0], sizes = [8, 32], strides = [1, 1]} : vector<8x48xf32> to vector<8x32xf32>
    %15 = vector.extract_strided_slice %13 {offsets = [0, 32], sizes = [8, 16], strides = [1, 1]} : vector<8x48xf32> to vector<8x16xf32>
    %cst_12 = arith.constant dense<0.000000e+00> : vector<32xf32>
    %16 = vector.multi_reduction <add>, %14, %cst_12 [0] : vector<8x32xf32> to vector<32xf32>
    %17 = vector.shape_cast %16 : vector<32xf32> to vector<1x32xf32>
    %18 = arith.mulf %14, %14 : vector<8x32xf32>
    %cst_13 = arith.constant dense<0.000000e+00> : vector<32xf32>
    %19 = vector.multi_reduction <add>, %18, %cst_13 [0] : vector<8x32xf32> to vector<32xf32>
    %20 = vector.shape_cast %19 : vector<32xf32> to vector<1x32xf32>
    %cst_14 = arith.constant 1.250000e-01 : f32
    %21 = vector.broadcast %cst_14 : f32 to vector<1x32xf32>
    %22 = arith.mulf %17, %21 : vector<1x32xf32>
    %cst_15 = arith.constant 1.250000e-01 : f32
    %23 = vector.broadcast %cst_15 : f32 to vector<1x32xf32>
    %24 = arith.mulf %20, %23 : vector<1x32xf32>
    %25 = arith.mulf %22, %22 : vector<1x32xf32>
    %26 = arith.subf %24, %25 : vector<1x32xf32>
    %cst_16 = arith.constant 9.99999974E-6 : f32
    %27 = vector.broadcast %cst_16 : f32 to vector<1x32xf32>
    %28 = arith.addf %26, %27 : vector<1x32xf32>
    %29 = math.rsqrt %28 : vector<1x32xf32>
    %30 = arith.mulf %6, %29 : vector<1x32xf32>
    %31 = arith.mulf %22, %30 : vector<1x32xf32>
    %32 = arith.subf %7, %31 : vector<1x32xf32>
    %33 = vector.broadcast %30 : vector<1x32xf32> to vector<8x32xf32>
    %34 = arith.mulf %14, %33 : vector<8x32xf32>
    %35 = vector.broadcast %32 : vector<1x32xf32> to vector<8x32xf32>
    %36 = arith.addf %34, %35 : vector<8x32xf32>
    %cst_17 = arith.constant 0.000000e+00 : f32
    %37 = vector.broadcast %cst_17 : f32 to vector<8x32xf32>
    %38 = arith.maximumf %36, %37 : vector<8x32xf32>
    %cst_18 = arith.constant dense<0.000000e+00> : vector<8x128xf32>
    %39 = tpu.matmul %38, %10, %cst_18 {dimension_numbers = #tpu.dot_dimension_numbers<[1], [0], [0], [1], [0, 0, 1, 1], [], []>} : vector<8x32xf32>, vector<32x128xf32>, vector<8x128xf32> -> vector<8x128xf32>
    %40 = vector.broadcast %8 : vector<1x128xf32> to vector<8x128xf32>
    %41 = arith.addf %39, %40 : vector<8x128xf32>
    %cst_19 = arith.constant 0.000000e+00 : f32
    %42 = vector.broadcast %cst_19 : f32 to vector<8x112xf32>
    %43 = tpu.concatenate %15, %42 in 1 : vector<8x16xf32>, vector<8x112xf32> -> vector<8x128xf32>
    %44 = arith.addf %41, %43 : vector<8x128xf32>
    %c0_20 = arith.constant 0 : index
    %c0_21 = arith.constant 0 : index
    %c0_22 = arith.constant 0 : index
    %45 = vector.load %arg4[%c0_20, %c0_21, %c0_22] : memref<1x8x128xf32, #tpu.memory_space<vmem>>, vector<1x8x128xf32>
    %46 = vector.shape_cast %45 : vector<1x8x128xf32> to vector<8x128xf32>
    %47 = vector.shape_cast %44 : vector<8x128xf32> to vector<1x8x128xf32>
    tpu.vector_store %arg4[%c0_20, %c0_21, %c0_22], %47 {strides = array<i32>} : memref<1x8x128xf32, #tpu.memory_space<vmem>>, vector<1x8x128xf32>,
    return
  }
  func.func @transform_0(%arg0: i32) -> (i32, i32, i32) {
    %c0_i32 = arith.constant 0 : i32
    %c0_i32_0 = arith.constant 0 : i32
    %c0_i32_1 = arith.constant 0 : i32
    return %arg0, %c0_i32, %c0_i32_0 : i32, i32, i32
  }
  func.func @transform_1(%arg0: i32) -> (i32, i32, i32) {
    %c0_i32 = arith.constant 0 : i32
    %c0_i32_0 = arith.constant 0 : i32
    %c0_i32_1 = arith.constant 0 : i32
    return %arg0, %c0_i32, %c0_i32_0 : i32, i32, i32
  }
  func.func @transform_2(%arg0: i32) -> (i32, i32) {
    %c0_i32 = arith.constant 0 : i32
    %c0_i32_0 = arith.constant 0 : i32
    %c0_i32_1 = arith.constant 0 : i32
    return %c0_i32, %c0_i32_0 : i32, i32
  }
  func.func @transform_3(%arg0: i32) -> (i32, i32, i32) {
    %c0_i32 = arith.constant 0 : i32
    %c0_i32_0 = arith.constant 0 : i32
    %c0_i32_1 = arith.constant 0 : i32
    return %arg0, %c0_i32, %c0_i32_0 : i32, i32, i32
  }
}

</mosaic_0001>

<bundles_post_ra>
// kernel: tpu_custom_call.1
= control target key start
LH: loop header
LB: loop body
LE: loop exit
PB: predicated region body
PF: predicated region fallthrough
CT: control target
= control target key end

     0   :  { %8 = vsyncpa [#allocation3], 0  ;;  %s1133_s0 = inlined_call_operand.hbm [shape: f32[4,8,16], index: 0, kind: input, shape index: {}]   ;;  %s1134_s1 = inlined_call_operand.hbm [shape: f32[4,8,16], index: 1, kind: input, shape index: {}]   ;;  %s1135_s2 = inlined_call_operand.hbm [shape: f32[72,128], index: 2, kind: input, shape index: {}]   ;;  %s1136_s3 = inlined_call_operand.hbm [shape: f32[4,8,128], index: 3, kind: output, shape index: {}]  }
   0x1   :  { %10 = vsyncpa [#allocation3 + $0x1], 0 }
   0x2   :  { %11 = vsyncpa [#allocation6], 0 }
   0x3   :  { %13 = vsyncpa [#allocation6 + $0x1], 0 }
   0x4   :  { %14 = vsyncpa [#allocation4], 0 }
   0x5   :  { %16 = vsyncpa [#allocation4 + $0x1], 0  ;;  %s901_s12 = smov 0   ;;  %s903_s13 = smov 0  }
   0x6   :  { %s905_s14 = smov 0   ;;  %s907_s15 = smov 0  }
   0x7 LB: > { %s922_s16 = sadd.s32 4294967295, %s868_s15   ;;  %s570_s17 = sadd.s32 4294967294, %s868_s15   ;;  %s868_s15 = sphi %s907_s15, %s1157_s15   ;;  %s864_s14 = sphi %s905_s14, %s1156_s14   ;;  %s860_s13 = sphi %s903_s13, %s1155_s13   ;;  %s856_s12 = sphi %s901_s12, %s1154_s12  }
   0x8   : > { %p42_p0 = scmp.ne.s32.totalorder %s860_s13, %s856_s12  ;;  %p1137_p1 = scmp.eq.s32.totalorder %s922_s16, 0 }
   0x9   : > { %p119_p3 = scmp.eq.s32.totalorder %s570_s17, 3  ;;  %p571_p5 = scmp.ge.s32.totalorder %s868_s15, 1 }
   0xa   : > { %p931_p4 = por %p1137_p1, %p42_p0  ;;  %p126_p7 = scmp.lt.s32.totalorder %s868_s15, 5 }
   0xb   : > { %p936_p6 = por %p119_p3, %p42_p0  ;;  %s870_s21 = smov [#allocation7]  }
   0xc   : > { %s1141_s18 = scalar_select %p931_p4, 1, 0 }
   0xd   : > { %s1142_s19 = scalar_select %p936_p6, 1, 0 }
   0xe   : > { %p941_p8 = pnand %p571_p5, %p126_p7  ;;  %s138_s22 = sshll.u32 %s870_s21, 4  ;;  %s139_s22 = int_to_ptr.vmem [resolvable:$true] %s138_s22 }
   0xf   : > { %s954_s24 = sadd.s32 1, %s868_s15   ;;  %s29_s25 = sadd.s32 1, %s864_s14 }
  0x10   : > { %s1143_s20 = scalar_select %p941_p8, 1, 0 }
  0x11   : > { %p645_p9 = pneg %p941_p8  ;;  %s26_s26 = ssub.s32 %s868_s15, %s954_s24 }
  0x12   : > { %s706_s29 = scalar_lea.hbm %s1135_s2, 1152 }
  0x13   : > { %p949_p10 = pnand %p645_p9, %p1137_p1  ;;  %p707_p11 = scmp.ne.s32.totalorder %s1135_s2, %s706_s29 }
  0x14   : > { %p713_p3 = scmp.lt.u32.totalorder %s706_s29, %s1135_s2 }
  0x15   : > { %p708_p12 = pneg %p949_p10 }
  0x17   : > { %p709_p13 = pnand %p708_p12, %p707_p11 }
  0x19   : > { %p710_p0 = pneg %p709_p13 }
  0x1b   : > { %p715_p5 = pnand %p713_p3, %p710_p0 }
  0x1d   : > { %718 = shalt.err (!%p715_p5)
}
  0x1e   : > { %s719_s7 = scalar_lea.vmem %s139_s22, 1152  ;;  %p727_p2 = scmp.lt.s32.totalorder %s139_s22, %s139_s22 }
  0x1f   : > { %p720_p7 = scmp.ne.s32.totalorder %s139_s22, %s719_s7  ;;  %p728_p6 = scmp.lt.s32.totalorder %s719_s7, %s719_s7 }
  0x21   : > { %p722_p9 = pnand %p720_p7, %p708_p12  ;;  %p729_p4 = por %p728_p6, %p727_p2 }
  0x23   : > { %p723_p1 = pneg %p722_p9 }
  0x25   : > { %p730_p8 = pnand %p729_p4, %p723_p1 }
  0x27   : > { %733 = shalt.err (!%p730_p8)
}
  0x28   : > { %s871_s8 = smov 128   ;;  %s872_s9 = smov 8  }
  0x29   : > { %648 = dma.hbm_to_vmem [thread:$0]  (!%p949_p10), %s1135_s2, 1152, %s139_s22, [#allocation6], %s871_s8, %s871_s8, %s872_s9  }
  0x2a   : > { %p27_p11 = scmp.eq.s32.totalorder %s26_s26, 0  ;;  %p36_p2 = scmp.ne.s32.totalorder %s864_s14, %s860_s13 }
  0x2b   : > { %p37_p1 = scmp.eq.s32.totalorder %s868_s15, 0  ;;  %p661_p4 = scmp.lt.s32.totalorder %s868_s15, 4 }
  0x2c   : > { %s980_s17 = scalar_select %p27_p11, %s864_s14, %s29_s25  }
  0x2d   : > { %p38_p6 = por %p37_p1, %p36_p2  ;;  %p1145_p8 = scmp.eq.s32.totalorder %s922_s16, 3 }
  0x2e   : > { %s152_s27 = sand.u32 1, %s864_s14   ;;  %s575_s28 = sshll.u32 %s868_s15, 7 }
  0x2f   : > { %p984_p12 = por %p1145_p8, %p36_p2  ;;  %s990_s29 = sshll.u32 %s152_s27, 3 }
  0x30   : > { %s995_s22 = scalar_lea.hbm %s1133_s0, %s575_s28  ;;  %s156_s25 = scalar_lea.vmem [#allocation2], %s990_s29 }
  0x31   : > { %s1146_s21 = scalar_select %p984_p12, 1, 0 }
  0x32   : > { %s163_s26 = sshll.u32 %s156_s25, 4  ;;  %p998_p10 = pnand %p661_p4, %p38_p6  ;;  %s1002_s26 = int_to_ptr.vmem [resolvable:$true] %s163_s26 }
  0x33   : > { %s1007_s7 = scalar_lea.hbm %s1134_s1, %s575_s28  ;;  %s153_s8 = scalar_lea.sflag [#allocation3], %s152_s27 }
  0x34   : > { %s734_s9 = scalar_lea.hbm %s995_s22, 128  ;;  %p736_p0 = pneg %p998_p10 }
  0x35   : > { %p735_p13 = scmp.ne.s32.totalorder %s995_s22, %s734_s9  ;;  %s739_s23 = scalar_lea.hbm %s1133_s0, 512 }
  0x36   : > { %p740_p7 = scmp.lt.u32.totalorder %s995_s22, %s1133_s0  ;;  %p741_p9 = scmp.lt.u32.totalorder %s739_s23, %s734_s9 }
  0x37   : > { %p737_p3 = pnand %p736_p0, %p735_p13  ;;  %p743_p2 = scmp.lt.u32.totalorder %s734_s9, %s995_s22 }
  0x38   : > { %p742_p11 = por %p741_p9, %p740_p7 }
  0x39   : > { %p738_p5 = pneg %p737_p3 }
  0x3a   : > { %p744_p1 = por %p743_p2, %p742_p11 }
  0x3c   : > { %p745_p4 = pnand %p744_p1, %p738_p5 }
  0x3e   : > { %748 = shalt.err (!%p745_p4)
}
  0x3f   : > { %s749_s27 = scalar_lea.vmem %s1002_s26, 128  ;;  %s873_s28 = smov [#allocation2]  }
  0x40   : > { %p750_p6 = scmp.ne.s32.totalorder %s1002_s26, %s749_s27  ;;  %s754_s5 = sshll.u32 %s873_s28, 4  ;;  %s755_s5 = int_to_ptr.vmem [resolvable:$false] %s754_s5 }
  0x41   : > { %s756_s6 = scalar_lea.vmem %s755_s5, 256  ;;  %p757_p3 = scmp.lt.s32.totalorder %s1002_s26, %s755_s5 }
  0x42   : > { %p752_p8 = pnand %p750_p6, %p736_p0  ;;  %p758_p7 = scmp.lt.s32.totalorder %s756_s6, %s749_s27 }
  0x44   : > { %p753_p13 = pneg %p752_p8  ;;  %p759_p9 = por %p758_p7, %p757_p3 }
  0x46   : > { %p760_p11 = pnand %p759_p9, %p753_p13 }
  0x48   : > { %763 = shalt.err (!%p760_p11)
}
  0x49   : > { %652 = dma.hbm_to_vmem [thread:$0]  (!%p998_p10), %s995_s22, 128, %s1002_s26, %s153_s8  }
  0x4a   : > { %s170_s9 = sand.u32 1, %s868_s15   ;;  %s174_s10 = scalar_lea.vmem [#allocation5], %s990_s29 }
  0x4b   : > { %s181_s11 = sshll.u32 %s174_s10, 4  ;;  %s171_s23 = scalar_lea.sflag [#allocation6], %s170_s9  ;;  %s182_s11 = int_to_ptr.vmem [resolvable:$true] %s181_s11 }
  0x4c   : > { %s764_s30 = scalar_lea.hbm %s1007_s7, 128  ;;  %s769_s28 = scalar_lea.hbm %s1134_s1, 512 }
  0x4d   : > { %p765_p5 = scmp.ne.s32.totalorder %s1007_s7, %s764_s30  ;;  %p770_p4 = scmp.lt.u32.totalorder %s1007_s7, %s1134_s1 }
  0x4e   : > { %p771_p6 = scmp.lt.u32.totalorder %s769_s28, %s764_s30  ;;  %p773_p13 = scmp.lt.u32.totalorder %s764_s30, %s1007_s7 }
  0x4f   : > { %p767_p2 = pnand %p765_p5, %p736_p0 }
  0x50   : > { %p772_p8 = por %p771_p6, %p770_p4 }
  0x51   : > { %p768_p1 = pneg %p767_p2 }
  0x52   : > { %p774_p3 = por %p773_p13, %p772_p8 }
  0x54   : > { %p775_p7 = pnand %p774_p3, %p768_p1 }
  0x56   : > { %778 = shalt.err (!%p775_p7)
}
  0x57   : > { %s779_s29 = scalar_lea.vmem %s182_s11, 128  ;;  %s874_s22 = smov [#allocation5]  }
  0x58   : > { %p780_p9 = scmp.ne.s32.totalorder %s182_s11, %s779_s29  ;;  %s784_s26 = sshll.u32 %s874_s22, 4  ;;  %s785_s26 = int_to_ptr.vmem [resolvable:$false] %s784_s26 }
  0x59   : > { %s786_s8 = scalar_lea.vmem %s785_s26, 256  ;;  %p787_p2 = scmp.lt.s32.totalorder %s182_s11, %s785_s26 }
  0x5a   : > { %p782_p11 = pnand %p780_p9, %p736_p0  ;;  %p788_p12 = scmp.lt.s32.totalorder %s786_s8, %s779_s29 }
  0x5c   : > { %p783_p5 = pneg %p782_p11  ;;  %p789_p4 = por %p788_p12, %p787_p2 }
  0x5e   : > { %p790_p6 = pnand %p789_p4, %p783_p5 }
  0x60   : > { %793 = shalt.err (!%p790_p6)
}
  0x61   : > { %655 = dma.hbm_to_vmem [thread:$0]  (!%p998_p10), %s1007_s7, 128, %s182_s11, %s171_s23  }
  0x62   : > { %p1148_p1 = scmp.ne.s32.totalorder %s1143_s20, 0 }
  0x63   : > { %s1058_s9 = sand.u32 (!%p1148_p1), 1, %s860_s13   ;;  %p1149_p12 = scmp.ne.s32.totalorder (!%p1148_p1), %s1141_s18, 0 }
  0x64   : > { %190 = sbr.rel (%p1148_p1) target bundleno = 721 (0x2d1), region = 32  ;;  %s1061_s10 = sshll.u32 (!%p1148_p1), %s1058_s9, 3 }
  0x65   : > { %s193_s30 = scalar_lea.sflag (!%p1148_p1), [#allocation3], %s1058_s9  ;;  %s196_s25 = scalar_lea.vmem (!%p1148_p1), [#allocation2], %s1061_s10 }
  0x6b   : > { %839 = dma.done.wait (%p1149_p12), %s193_s30, 128  }
  0x6c   : > { %841 = vsyncadd (%p1149_p12), %s193_s30, 4294967168  ;;  %s201_s20 = sand.u32 1, %s922_s16   ;;  %s205_s7 = scalar_lea.vmem [#allocation5], %s1061_s10 }
  0x6d   : > { %s202_s4 = scalar_lea.sflag [#allocation6], %s201_s20 }
  0x6e   : > { %843 = dma.done.wait (%p1149_p12), %s202_s4, 128  }
  0x6f   : > { %845 = vsyncadd (%p1149_p12), %s202_s4, 4294967168  ;;  %p1150_p10 = scmp.eq.s32.totalorder %s922_s16, 0 }
  0x71   : > { %847 = dma.done.wait (%p1150_p10), [#allocation6], 1152   ;;  %p1151_p0 = pmov %p1150_p10 }
  0x72   : > { %v875_v0 = vmov 0.0|0.0   ;;  %vm876_vm0 = vmmov 0   ;;  %v877_v1 = vmov 0.0   ;;  %v238_v2 = vld [vmem:[%s205_s7] sm:$0xff]  ;;  %v249_v3 = vld [vmem:[#allocation7 + $0x8] sm:$0xff]  ;;  %s878_s11 = smov 16   ;;  %v359_v42 = vlaneseq }
  0x73   : > { %849 = vsyncadd (%p1151_p0), [#allocation6], 4294966144  ;;  %623 = vmatprep.subr.bf16.mxu0 %v875_v0  ;;  %629 = vmatprep.subr.bf16.mxu1 %v875_v0  ;;  %v250_v4 = vld [vmem:[#allocation7 + $0x10] sm:$0xff]  ;;  %v251_v6 = vld [vmem:[#allocation7 + $0x18] sm:$0xff]  ;;  %vm243_vm1 = vcmask 130048   ;;  %vm261_vm2 = vcmask 261120  }
  0x74   : > { %609 = vmatprep.mubr.msk.f32.mxu0 %vm876_vm0, %v877_v1  ;;  %620 = vmatprep.mubr.msk.f32.mxu1 %vm876_vm0, %v877_v1  ;;  %v624_v5 = vpack.c.bf16 %v250_v4, %v249_v3  ;;  %v252_v7 = vld [vmem:[#allocation7 + $0x20] sm:$0xff]  ;;  %v253_v12 = vld [vmem:[#allocation7 + $0x28] sm:$0xff]  ;;  %v254_v13 = vld [vmem:[#allocation7 + $0x30] sm:$0xff]  ;;  %s879_s18 = smov 96   ;;  %v360_v43 = vshrl.u32 %v359_v42, 7  ;;  %s588_s23 = sshll.u32 %s922_s16, 7 }
  0x75   : > { %240 = vrot.lane.b32.xlu0 %v238_v2, %s878_s11  ;;  %v627_v8 = vpack.c.bf16 %v252_v7, %v251_v6  ;;  %v237_v9 = vld [vmem:[%s196_s25] sm:$0xff]  ;;  %v630_v14 = vpack.c.bf16 %v254_v13, %v253_v12  ;;  %v255_v15 = vld [vmem:[#allocation7 + $0x38] sm:$0xff]  ;;  %s236_s27 = scalar_lea.vmem [#allocation8], %s1061_s10  ;;  %s1090_s29 = scalar_lea.hbm %s1136_s3, %s588_s23 }
  0x76   : > { %625 = vmatpush3.bf16.msra.mxu0 %v624_v5  ;;  %v256_v16 = vld [vmem:[#allocation7 + $0x40] sm:$0xff]  ;;  %v361_v45 = vsub.s32 0, %v360_v43  ;;  %s468_s28 = sshll.u32 %s236_s27, 4  ;;  %s455_s22 = scalar_lea.sflag [#allocation4], %s1058_s9  ;;  %s1092_s28 = int_to_ptr.vmem [resolvable:$true] %s468_s28 }
  0x77   : > { %626 = vmatprep.subr.bf16.mxu0 %v875_v0  ;;  %631 = vmatpush3.bf16.msra.mxu1 %v630_v14  ;;  %v633_v17 = vpack.c.bf16 %v256_v16, %v255_v15  ;;  %v583_v18 = vld [vmem:[#allocation7] ss:$0 sm:$0xff]  ;;  %v246_v44 = vld [vmem:[#allocation7 + $0x1] sm:$0x1]  ;;  %v247_v48 = vld [vmem:[#allocation7 + $0x2] sm:$0x1] }
  0x78   : > { %632 = vmatprep.subr.bf16.mxu1 %v875_v0  ;;  %v585_v56 = vld [vmem:[#allocation7 + $0x3] ss:$0 sm:$0xff]  ;;  %s794_s16 = scalar_lea.vmem %s1092_s28, 128  ;;  %p1152_p13 = scmp.ne.s32.totalorder %s1146_s21, 0 }
  0x79   : > { %p795_p8 = scmp.ne.s32.totalorder %s1092_s28, %s794_s16  ;;  %s880_s26 = smov [#allocation8]  }
  0x7a   : > { %628 = vmatpush3.bf16.msra.mxu0 %v627_v8  ;;  %s798_s8 = sshll.u32 %s880_s26, 4  ;;  %s799_s8 = int_to_ptr.vmem [resolvable:$false] %s798_s8 }
  0x7b   : > { %634 = vmatpush3.bf16.msra.mxu1 %v633_v17  ;;  %p796_p3 = pnand %p795_p8, %p1152_p13  ;;  %s800_s10 = scalar_lea.vmem %s799_s8, 256 }
  0x7c   : > { %p801_p9 = scmp.lt.s32.totalorder %s1092_s28, %s799_s8  ;;  %p802_p11 = scmp.lt.s32.totalorder %s800_s10, %s794_s16 }
  0x7d   : > { %p797_p7 = pneg %p796_p3 }
  0x7e   : > { %p803_p5 = por %p802_p11, %p801_p9 }
  0x80   : > { %p804_p2 = pnand %p803_p5, %p797_p7 }
  0xe7   : > { %v241_v10 = vpop.permute.xlu0 %240 }
  0xe8   : > { %v244_v11 = vsel %vm243_vm1, %v237_v9, %v241_v10 }
  0xe9   : > { %610 = vmatmul.mubr.msk.f32.vlgmr.msra.gmra.mrb[0].mxu0 %vm261_vm2, %v244_v11 }
 0x1bc   : > { %v331_v19 = vpop.f32.mrb[0].mxu0 }
 0x1bd   : > { %v332_v20 = vadd.f32 %v583_v18, %v331_v19  ;;  %v611_v21 = vpop.f32.mrb[1].mxu0 }
 0x1bf   : > { %v335_v22 = vsel %vm261_vm2, %v332_v20, 0.0  ;;  %v342_v23 = vmul.f32 %v332_v20, %v332_v20  ;;  %448 = vrot.lane.b32.xlu0 %v332_v20, %s879_s18 }
 0x1c0   : > { %v336_v24 = vrot.slane %v335_v22, 4 }
 0x1c1   : > { %v343_v25 = vsel %vm261_vm2, %v342_v23, 0.0 }
 0x1c2   : > { %v337_v26 = vadd.f32 %v336_v24, %v335_v22  ;;  %v344_v27 = vrot.slane %v343_v25, 4 }
 0x1c4   : > { %v338_v28 = vrot.slane %v337_v26, 2  ;;  %v345_v29 = vadd.f32 %v344_v27, %v343_v25 }
 0x1c6   : > { %v339_v30 = vadd.f32 %v338_v28, %v337_v26  ;;  %v346_v31 = vrot.slane %v345_v29, 2 }
 0x1c8   : > { %v340_v32 = vrot.slane %v339_v30, 1  ;;  %v347_v33 = vadd.f32 %v346_v31, %v345_v29 }
 0x1ca   : > { %v341_v34 = vadd.f32 %v340_v32, %v339_v30  ;;  %v348_v35 = vrot.slane %v347_v33, 1 }
 0x1cc   : > { %v349_v36 = vadd.f32 %v348_v35, %v347_v33  ;;  %v350_v37 = vmul.f32 0.125, %v341_v34 }
 0x1ce   : > { %v351_v38 = vmul.f32 0.125, %v349_v36  ;;  %v352_v39 = vmul.f32 %v350_v37, %v350_v37 }
 0x1d0   : > { %v353_v40 = vsub.f32 %v351_v38, %v352_v39 }
 0x1d2   : > { %v354_v41 = vadd.f32 1e-05, %v353_v40 }
 0x1d4   : > { %704 = vrsqrt.f32 %v354_v41 }
 0x1de   : > { %v705_v46 = vpop.eup %704 }
 0x1df   : > { %v356_v47 = vmul.f32 %v705_v46, %v246_v44 }
 0x1e1   : > { %v362_v49 = vrot.slane %v356_v47, %v361_v45  ;;  %v357_v50 = vmul.f32 %v356_v47, %v350_v37 }
 0x1e3   : > { %v358_v51 = vsub.f32 %v247_v48, %v357_v50  ;;  %v363_v52 = vmul.f32 %v362_v49, %v332_v20 }
 0x1e5   : > { %v367_v53 = vrot.slane %v358_v51, %v361_v45 }
 0x1e7   : > { %v368_v54 = vadd.f32 %v367_v53, %v363_v52 }
 0x1e9   : > { %v369_v55 = vmax.f32 %v368_v54, 0.0 }
 0x1eb   : > { %621 = vmatmul.mubr.msk.f32.vlgmr.msra.gmra.mrb[0].mxu1 %vm261_vm2, %v369_v55 }
 0x231   : > { %v449_v57 = vpop.permute.xlu0 %448 }
 0x232   : > { %v451_v61 = vsel %vm243_vm1, %v449_v57, 0.0 }
 0x2be   : > { %v443_v58 = vpop.f32.mrb[0].mxu1 }
 0x2bf   : > { %v444_v59 = vadd.f32 %v585_v56, %v443_v58  ;;  %v622_v60 = vpop.f32.mrb[1].mxu1 }
 0x2c1   : > { %v452_v62 = vadd.f32 %v451_v61, %v444_v59 }
 0x2c3   : > { %453 = vst [vmem:[%s236_s27] sm:$0xff] %v452_v62 }
 0x2c4   : > { %807 = shalt.err (!%p804_p2)
}
 0x2c5   : > { %s808_s9 = scalar_lea.hbm %s1090_s29, 128  ;;  %s812_s20 = scalar_lea.hbm %s1136_s3, 512 }
 0x2c6   : > { %p809_p4 = scmp.ne.s32.totalorder %s1090_s29, %s808_s9  ;;  %p813_p12 = scmp.lt.u32.totalorder %s1090_s29, %s1136_s3 }
 0x2c7   : > { %p814_p10 = scmp.lt.u32.totalorder %s812_s20, %s808_s9  ;;  %p816_p8 = scmp.lt.u32.totalorder %s808_s9, %s1090_s29 }
 0x2c8   : > { %p810_p6 = pnand %p809_p4, %p1152_p13 }
 0x2c9   : > { %p815_p0 = por %p814_p10, %p813_p12 }
 0x2ca   : > { %p811_p1 = pneg %p810_p6 }
 0x2cb   : > { %p817_p3 = por %p816_p8, %p815_p0 }
 0x2cd   : > { %p818_p7 = pnand %p817_p3, %p811_p1 }
 0x2cf   : > { %821 = shalt.err (!%p818_p7)
}
 0x2d0   : > { %643 = dma.vmem_to_hbm [thread:$0]  (%p1152_p13), %s1092_s28, 128, %s1090_s29, %s455_s22  }
 0x2d1 PF: > { %p663_p9 = scmp.ge.s32.totalorder %s868_s15, 2  ;;  %s480_s11 = sand.u32 1, %s856_s12  }
 0x2d2   : > { %p1153_p11 = scmp.ne.s32.totalorder %s1142_s19, 0  ;;  %s481_s18 = scalar_lea.sflag [#allocation4], %s480_s11 }
 0x2d4   : > { %p657_p5 = pnand %p663_p9, %p1153_p11 }
 0x2d6   : > { %851 = dma.done.wait (!%p657_p5), %s481_s18, 128  }
 0x2d7   : > { %853 = vsyncadd (!%p657_p5), %s481_s18, 4294967168  ;;  %p19_p2 = scmp.ge.s32.totalorder %s954_s24, 6   ;;  %s1154_s12 = smov %s860_s13 }
 0x2d8   : > { %s1155_s13 = smov %s864_s14  ;;  %s1156_s14 = smov %s980_s17 }
 0x2d9   : > { %s1157_s15 = smov %s954_s24  ;;  %21 = sbr.rel (!%p19_p2) target bundleno = 7 (0x7), region = 94 }
 0x2e0   :  { %486 = vsyncpa [#allocation3], 1 }
 0x2e1   :  { %488 = vsyncpa [#allocation3 + $0x1], 1 }
 0x2e2   :  { %489 = vsyncpa [#allocation6], 1 }
 0x2e3   :  { %491 = vsyncpa [#allocation6 + $0x1], 1 }
 0x2e4   :  { %492 = vsyncpa [#allocation4], 1 }
 0x2e5   :  { %494 = vsyncpa [#allocation4 + $0x1], 1 }

</bundles_post_ra>
